<compile_context>
chip_gen: v7x
topology: tpu7x:2x2x1
jax: 0.10.0
libtpu: 0.0.40
codegen_flags: <defaults>
</compile_context>

<pallas_src>
import jax
import jax.numpy as jnp
from jax.experimental import pallas as pl
from jax.experimental.pallas import tpu as pltpu

LANE = 128
SUBLANE = 8


def _round_up(x, m):
    return ((x + m - 1) // m) * m


def _pad2(a, rows, cols):
    r, c = a.shape
    if r == rows and c == cols:
        return a
    return jnp.pad(a, ((0, rows - r), (0, cols - c)))


def vanillanet_kernel(x_ref, w1_ref, b1_ref, w2_ref, b2_ref, w3_ref, b3_ref, y_ref):
    # Hidden layer 1: MXU matmul (operands may be bf16), f32 accumulate,
    # bias-add + ReLU in f32 (VPU-friendly on v5e which has no bf16 VALU).
    h1 = jnp.dot(x_ref[...], w1_ref[...], preferred_element_type=jnp.float32)
    h1 = jnp.maximum(h1 + b1_ref[...], 0.0)
    # Hidden layer 2
    h2 = jnp.dot(h1.astype(w2_ref.dtype), w2_ref[...], preferred_element_type=jnp.float32)
    h2 = jnp.maximum(h2 + b2_ref[...], 0.0)
    # fc_head (no nonlinearity)
    y = jnp.dot(h2.astype(w3_ref.dtype), w3_ref[...], preferred_element_type=jnp.float32)
    y_ref[...] = (y + b3_ref[...]).astype(y_ref.dtype)


def prepare_params(params, compute_dtype=jnp.bfloat16):
    """One-time weight prep: pad the hidden feature axes to 128 lanes and cast.

    Input/ output feature axes (state_dim, output_dim) stay at natural width so the
    per-step x/y HBM streams are not inflated. Padded rows/cols and padded bias lanes
    are zero, so padded hidden lanes stay exactly 0 through ReLU (no contamination).
    Weights are cast to compute_dtype (MXU operands); biases stay f32 (added to the
    f32 accumulator).
    """
    D, H1 = params["w1"].shape
    H2 = params["w2"].shape[1]
    O = params["w3"].shape[1]
    H1p, H2p = _round_up(H1, LANE), _round_up(H2, LANE)
    return {
        "w1": _pad2(params["w1"], D, H1p).astype(compute_dtype),
        "b1": _pad2(params["b1"], 1, H1p).astype(jnp.float32),
        "w2": _pad2(params["w2"], H1p, H2p).astype(compute_dtype),
        "b2": _pad2(params["b2"], 1, H2p).astype(jnp.float32),
        "w3": _pad2(params["w3"], H2p, O).astype(compute_dtype),
        "b3": params["b3"].astype(jnp.float32),
    }


def vanillanet_forward(x, prepared, *, batch_tile=None):
    """x: [B, state_dim].  prepared: output of prepare_params (padded + cast weights).

    MXU operands use prepared['w1'].dtype (bf16 by default; x is cast once here);
    accumulation, bias-add and ReLU are f32; the output is f32 at natural width.
    """
    B, D = x.shape
    Dw, H1p = prepared["w1"].shape
    H2p = prepared["w2"].shape[1]
    O = prepared["w3"].shape[1]
    assert D == Dw, f"state_dim mismatch: x has {D}, weights expect {Dw}"
    compute_dtype = prepared["w1"].dtype

    # Batch tile: multiple of 8, capped at 1024 rows. Small batches -> a single grid
    # step (grid is a serial loop on v5e/v6e; per-step overhead ~600 cycles). Large
    # batches -> multi-step grid that pipelines DMA and shards across v7x's two TCs.
    if batch_tile is None:
        tb = min(1024, _round_up(B, SUBLANE))
    else:
        tb = batch_tile
    assert tb % SUBLANE == 0
    Bp = _round_up(B, tb)

    xp = x
    if xp.dtype != compute_dtype:
        xp = xp.astype(compute_dtype)
    if Bp != B:
        xp = jnp.pad(xp, ((0, Bp - B), (0, 0)))

    full = lambda i: (0, 0)  # weights/biases are resident across the batch grid
    grid_spec = pltpu.PrefetchScalarGridSpec(
        num_scalar_prefetch=0,
        grid=(Bp // tb,),
        in_specs=[
            pl.BlockSpec((tb, D), lambda i: (i, 0)),   # x tile (natural feature width)
            pl.BlockSpec((D, H1p), full),              # W1
            pl.BlockSpec((1, H1p), full),              # b1
            pl.BlockSpec((H1p, H2p), full),            # W2
            pl.BlockSpec((1, H2p), full),              # b2
            pl.BlockSpec((H2p, O), full),              # W3 (fc_head, natural out width)
            pl.BlockSpec((1, O), full),                # b3 (fc_head)
        ],
        out_specs=pl.BlockSpec((tb, O), lambda i: (i, 0)),
    )

    witems = jnp.dtype(compute_dtype).itemsize
    flops = 2 * Bp * (D * H1p + H1p * H2p + H2p * O)
    bytes_accessed = (
        Bp * D * witems                                # x stream in
        + Bp * O * 4                                   # y stream out (f32, natural width)
        + (D * H1p + H1p * H2p + H2p * O) * witems     # weights (resident)
        + (H1p + H2p + O) * 4                          # biases (f32)
    )
    cost = pl.CostEstimate(flops=flops, transcendentals=0,
                           bytes_accessed=bytes_accessed)

    y = pl.pallas_call(
        vanillanet_kernel,
        out_shape=jax.ShapeDtypeStruct((Bp, O), jnp.float32),
        grid_spec=grid_spec,
        compiler_params=pltpu.CompilerParams(dimension_semantics=("parallel",)),
        cost_estimate=cost,
    )(xp, prepared["w1"], prepared["b1"], prepared["w2"], prepared["b2"],
      prepared["w3"], prepared["b3"])
    return y if Bp == B else y[:B]


def init_params(key, state_dim, hidden1, hidden2, output_dim):
    """Deterministic init mimicking deep_rl's layer_init (scaled weights, zero bias)."""
    k1, k2, k3 = jax.random.split(key, 3)
    # TODO(synk): layer_init uses orthogonal init; plain scaled-normal used here (deterministic).
    w1 = jax.random.normal(k1, (state_dim, hidden1), jnp.float32) / jnp.sqrt(state_dim)
    w2 = jax.random.normal(k2, (hidden1, hidden2), jnp.float32) / jnp.sqrt(hidden1)
    w3 = jax.random.normal(k3, (hidden2, output_dim), jnp.float32) * 1e-3  # fc_head scale=1e-3
    return {
        "w1": w1, "b1": jnp.zeros((1, hidden1), jnp.float32),
        "w2": w2, "b2": jnp.zeros((1, hidden2), jnp.float32),
        "w3": w3, "b3": jnp.zeros((1, output_dim), jnp.float32),
    }


def reference_forward(x, p, compute_dtype=jnp.float32):
    cd = compute_dtype
    h1 = jnp.maximum(
        jnp.dot(x.astype(cd), p["w1"].astype(cd), preferred_element_type=jnp.float32)
        + p["b1"], 0.0)
    h2 = jnp.maximum(
        jnp.dot(h1.astype(cd), p["w2"].astype(cd), preferred_element_type=jnp.float32)
        + p["b2"], 0.0)
    return (jnp.dot(h2.astype(cd), p["w3"].astype(cd), preferred_element_type=jnp.float32)
            + p["b3"])


if __name__ == "__main__":
    key = jax.random.PRNGKey(0)
    kx, kx2, kp = jax.random.split(key, 3)

    B, STATE_DIM, H1, H2, OUT = 8, 16, 32, 32, 4
    x = jax.random.normal(kx, (B, STATE_DIM), jnp.float32)
    params = init_params(kp, STATE_DIM, H1, H2, OUT)

    # f32 compute path (exact vs reference). Weights are prepared (padded+cast) once.
    prepared_f32 = prepare_params(params, compute_dtype=jnp.float32)
    y = jax.block_until_ready(vanillanet_forward(x, prepared_f32))
    y_ref = reference_forward(x, params)
    assert y.shape == (B, OUT)
    assert jnp.allclose(y, y_ref, atol=1e-5, rtol=1e-5)

    # Default bf16 MXU-operand path (f32 accumulate), vs a bf16-operand reference.
    prepared_bf16 = prepare_params(params)  # compute_dtype defaults to bfloat16
    y_bf16 = jax.block_until_ready(vanillanet_forward(x, prepared_bf16))
    y_ref_bf16 = reference_forward(x, params, compute_dtype=jnp.bfloat16)
    assert jnp.allclose(y_bf16, y_ref_bf16, atol=2e-3, rtol=2e-2)

    # Non-multiple-of-8 batch: exercises batch padding + the trailing slice.
    B2 = 37
    x2 = jax.random.normal(kx2, (B2, STATE_DIM), jnp.float32)
    y2 = jax.block_until_ready(vanillanet_forward(x2, prepared_f32))
    y2_ref = reference_forward(x2, params)
    assert y2.shape == (B2, OUT)
    assert jnp.allclose(y2, y2_ref, atol=1e-5, rtol=1e-5)

    # Explicit small batch_tile: forces a multi-step grid (pipelined DMA / megacore path).
    y3 = jax.block_until_ready(vanillanet_forward(x2, prepared_f32, batch_tile=8))
    assert jnp.allclose(y3, y2_ref, atol=1e-5, rtol=1e-5)

    print("KERNEL_OK")
</pallas_src>

<mosaic_0001>
module attributes {stable_mosaic.version = 11 : i64} {
  func.func @vanillanet_kernel(%arg0: i32, %arg1: memref<8x16xf32, #tpu.memory_space<vmem>>, %arg2: memref<16x128xf32, #tpu.memory_space<vmem>>, %arg3: memref<1x128xf32, #tpu.memory_space<vmem>>, %arg4: memref<128x128xf32, #tpu.memory_space<vmem>>, %arg5: memref<1x128xf32, #tpu.memory_space<vmem>>, %arg6: memref<128x4xf32, #tpu.memory_space<vmem>>, %arg7: memref<1x4xf32, #tpu.memory_space<vmem>>, %arg8: memref<8x4xf32, #tpu.memory_space<vmem>>) attributes {dimension_semantics = [#tpu.dimension_semantics<parallel>], iteration_bounds = array<i64: 1>, scalar_prefetch = 0 : i64, scratch_operands = 0 : i64, tpu.core_type = #tpu.core_type<tc>, window_params = [{transform_indices = @transform_0, window_bounds = array<i64: 8, 16>}, {pipeline_mode = #tpu.pipeline_mode<synchronous>, transform_indices = @transform_1, window_bounds = array<i64: 16, 128>}, {pipeline_mode = #tpu.pipeline_mode<synchronous>, transform_indices = @transform_2, window_bounds = array<i64: 1, 128>}, {pipeline_mode = #tpu.pipeline_mode<synchronous>, transform_indices = @transform_3, window_bounds = array<i64: 128, 128>}, {pipeline_mode = #tpu.pipeline_mode<synchronous>, transform_indices = @transform_4, window_bounds = array<i64: 1, 128>}, {pipeline_mode = #tpu.pipeline_mode<synchronous>, transform_indices = @transform_5, window_bounds = array<i64: 128, 4>}, {pipeline_mode = #tpu.pipeline_mode<synchronous>, transform_indices = @transform_6, window_bounds = array<i64: 1, 4>}, {transform_indices = @transform_7, window_bounds = array<i64: 8, 4>}]} {
    %c0 = arith.constant 0 : index
    %c0_0 = arith.constant 0 : index
    %0 = vector.load %arg1[%c0, %c0_0] : memref<8x16xf32, #tpu.memory_space<vmem>>, vector<8x16xf32>
    %c0_1 = arith.constant 0 : index
    %c0_2 = arith.constant 0 : index
    %1 = vector.load %arg2[%c0_1, %c0_2] : memref<16x128xf32, #tpu.memory_space<vmem>>, vector<16x128xf32>
    %cst = arith.constant dense<0.000000e+00> : vector<8x128xf32>
    %2 = tpu.matmul %0, %1, %cst {dimension_numbers = #tpu.dot_dimension_numbers<[1], [0], [0], [1], [0, 0, 1, 1], [], []>} : vector<8x16xf32>, vector<16x128xf32>, vector<8x128xf32> -> vector<8x128xf32>
    %c0_3 = arith.constant 0 : index
    %c0_4 = arith.constant 0 : index
    %3 = vector.load %arg3[%c0_3, %c0_4] : memref<1x128xf32, #tpu.memory_space<vmem>>, vector<1x128xf32>
    %4 = vector.broadcast %3 : vector<1x128xf32> to vector<8x128xf32>
    %5 = arith.addf %2, %4 : vector<8x128xf32>
    %cst_5 = arith.constant 0.000000e+00 : f32
    %6 = vector.broadcast %cst_5 : f32 to vector<8x128xf32>
    %7 = arith.maximumf %5, %6 : vector<8x128xf32>
    %c0_6 = arith.constant 0 : index
    %c0_7 = arith.constant 0 : index
    %8 = vector.load %arg4[%c0_6, %c0_7] : memref<128x128xf32, #tpu.memory_space<vmem>>, vector<128x128xf32>
    %cst_8 = arith.constant dense<0.000000e+00> : vector<8x128xf32>
    %9 = tpu.matmul %7, %8, %cst_8 {dimension_numbers = #tpu.dot_dimension_numbers<[1], [0], [0], [1], [0, 0, 1, 1], [], []>} : vector<8x128xf32>, vector<128x128xf32>, vector<8x128xf32> -> vector<8x128xf32>
    %c0_9 = arith.constant 0 : index
    %c0_10 = arith.constant 0 : index
    %10 = vector.load %arg5[%c0_9, %c0_10] : memref<1x128xf32, #tpu.memory_space<vmem>>, vector<1x128xf32>
    %11 = vector.broadcast %10 : vector<1x128xf32> to vector<8x128xf32>
    %12 = arith.addf %9, %11 : vector<8x128xf32>
    %cst_11 = arith.constant 0.000000e+00 : f32
    %13 = vector.broadcast %cst_11 : f32 to vector<8x128xf32>
    %14 = arith.maximumf %12, %13 : vector<8x128xf32>
    %c0_12 = arith.constant 0 : index
    %c0_13 = arith.constant 0 : index
    %15 = vector.load %arg6[%c0_12, %c0_13] : memref<128x4xf32, #tpu.memory_space<vmem>>, vector<128x4xf32>
    %cst_14 = arith.constant dense<0.000000e+00> : vector<8x4xf32>
    %16 = tpu.matmul %14, %15, %cst_14 {dimension_numbers = #tpu.dot_dimension_numbers<[1], [0], [0], [1], [0, 0, 1, 1], [], []>} : vector<8x128xf32>, vector<128x4xf32>, vector<8x4xf32> -> vector<8x4xf32>
    %c0_15 = arith.constant 0 : index
    %c0_16 = arith.constant 0 : index
    %17 = vector.load %arg7[%c0_15, %c0_16] : memref<1x4xf32, #tpu.memory_space<vmem>>, vector<1x4xf32>
    %18 = vector.broadcast %17 : vector<1x4xf32> to vector<8x4xf32>
    %19 = arith.addf %16, %18 : vector<8x4xf32>
    %c0_17 = arith.constant 0 : index
    %c0_18 = arith.constant 0 : index
    %20 = vector.load %arg8[%c0_17, %c0_18] : memref<8x4xf32, #tpu.memory_space<vmem>>, vector<8x4xf32>
    tpu.vector_store %arg8[%c0_17, %c0_18], %19 {strides = array<i32>} : memref<8x4xf32, #tpu.memory_space<vmem>>, vector<8x4xf32>,
    return
  }
  func.func @transform_0(%arg0: i32) -> (i32, i32) {
    %c0_i32 = arith.constant 0 : i32
    %c0_i32_0 = arith.constant 0 : i32
    return %arg0, %c0_i32 : i32, i32
  }
  func.func @transform_1(%arg0: i32) -> (i32, i32) {
    %c0_i32 = arith.constant 0 : i32
    %c0_i32_0 = arith.constant 0 : i32
    %c0_i32_1 = arith.constant 0 : i32
    return %c0_i32, %c0_i32_0 : i32, i32
  }
  func.func @transform_2(%arg0: i32) -> (i32, i32) {
    %c0_i32 = arith.constant 0 : i32
    %c0_i32_0 = arith.constant 0 : i32
    %c0_i32_1 = arith.constant 0 : i32
    return %c0_i32, %c0_i32_0 : i32, i32
  }
  func.func @transform_3(%arg0: i32) -> (i32, i32) {
    %c0_i32 = arith.constant 0 : i32
    %c0_i32_0 = arith.constant 0 : i32
    %c0_i32_1 = arith.constant 0 : i32
    return %c0_i32, %c0_i32_0 : i32, i32
  }
  func.func @transform_4(%arg0: i32) -> (i32, i32) {
    %c0_i32 = arith.constant 0 : i32
    %c0_i32_0 = arith.constant 0 : i32
    %c0_i32_1 = arith.constant 0 : i32
    return %c0_i32, %c0_i32_0 : i32, i32
  }
  func.func @transform_5(%arg0: i32) -> (i32, i32) {
    %c0_i32 = arith.constant 0 : i32
    %c0_i32_0 = arith.constant 0 : i32
    %c0_i32_1 = arith.constant 0 : i32
    return %c0_i32, %c0_i32_0 : i32, i32
  }
  func.func @transform_6(%arg0: i32) -> (i32, i32) {
    %c0_i32 = arith.constant 0 : i32
    %c0_i32_0 = arith.constant 0 : i32
    %c0_i32_1 = arith.constant 0 : i32
    return %c0_i32, %c0_i32_0 : i32, i32
  }
  func.func @transform_7(%arg0: i32) -> (i32, i32) {
    %c0_i32 = arith.constant 0 : i32
    %c0_i32_0 = arith.constant 0 : i32
    return %arg0, %c0_i32 : i32, i32
  }
}

</mosaic_0001>

<bundles_post_ra>
// kernel: tpu_custom_call.1
= control target key start
LH: loop header
LB: loop body
LE: loop exit
PB: predicated region body
PF: predicated region fallthrough
CT: control target
= control target key end

     0   :  { %12 = vsyncpa [#allocation3], 0  ;;  %s518_s24 = smov [#allocation2]   ;;  %s707_s0 = inlined_call_operand.vmem [shape: f32[8,16], index: 0, kind: input, shape index: {}]   ;;  %s708_s1 = inlined_call_operand.hbm [shape: f32[16,128], index: 1, kind: input, shape index: {}]   ;;  %s709_s2 = inlined_call_operand.vmem [shape: f32[1,128], index: 2, kind: input, shape index: {}]   ;;  %s710_s3 = inlined_call_operand.vmem [shape: f32[128,128], index: 3, kind: input, shape index: {}]   ;;  %s711_s4 = inlined_call_operand.vmem [shape: f32[1,128], index: 4, kind: input, shape index: {}]   ;;  %s712_s5 = inlined_call_operand.vmem [shape: f32[128,4], index: 5, kind: input, shape index: {}]   ;;  %s713_s6 = inlined_call_operand.vmem [shape: f32[1,4], index: 6, kind: input, shape index: {}]   ;;  %s714_s7 = inlined_call_operand.vmem [shape: f32[8,4], index: 7, kind: output, shape index: {}]  }
   0x1   :  { %s20_s25 = sshll.u32 %s518_s24, 4  ;;  %s494_s28 = scalar_lea.hbm %s708_s1, 256  ;;  %s21_s25 = int_to_ptr.vmem [resolvable:$true] %s20_s25 }
   0x2   :  { %p495_p0 = scmp.ne.s32.totalorder %s708_s1, %s494_s28  ;;  %p498_p1 = scmp.lt.u32.totalorder %s494_s28, %s708_s1 }
   0x4   :  { %p500_p2 = pnand %p498_p1, %p495_p0 }
   0x6   :  { %503 = shalt.err (!%p500_p2)
}
   0x7   :  { %s504_s10 = scalar_lea.vmem %s21_s25, 256  ;;  %p509_p4 = scmp.lt.s32.totalorder %s21_s25, %s21_s25 }
   0x8   :  { %p505_p3 = scmp.ne.s32.totalorder %s21_s25, %s504_s10  ;;  %p510_p5 = scmp.lt.s32.totalorder %s504_s10, %s504_s10 }
   0xa   :  { %p511_p6 = por %p510_p5, %p509_p4 }
   0xc   :  { %p512_p7 = pnand %p511_p6, %p505_p3 }
   0xe   :  { %515 = shalt.err (!%p512_p7)
}
   0xf   :  { %s519_s11 = smov 128   ;;  %s520_s12 = smov 8  }
  0x10   :  { %26 = dma.hbm_to_vmem [thread:$0]  %s708_s1, 256, %s21_s25, [#allocation3], %s519_s11, %s519_s11, %s520_s12  }
  0x11   :  { %516 = dma.done.wait [#allocation3], 256  }
  0x12   :  { %517 = vsyncadd [#allocation3], 4294967040  ;;  %v521_v0 = vmov 0.0|0.0   ;;  %vm522_vm0 = vmmov 0   ;;  %v523_v1 = vmov 0.0   ;;  %v41_v2 = vld [vmem:[#allocation2] sm:$0xff] }
  0x13   :  { %437 = vmatprep.subr.bf16.mxu0 %v521_v0  ;;  %364 = vmatprep.mubr.msk.f32.mxu0 %vm522_vm0, %v523_v1  ;;  %v42_v3 = vld [vmem:[#allocation2 + $0x8] sm:$0xff]  ;;  %v125_v5 = vld [vmem:[%s710_s3] sm:$0xff]  ;;  %v127_v7 = vld [vmem:[%s710_s3 + $0x10] sm:$0xff]  ;;  %vm50_vm1 = vcmask 130048   ;;  %vm312_vm2 = vcmask 31744  }
  0x14   :  { %440 = vmatprep.subr.bf16.mxu1 %v521_v0  ;;  %399 = vmatprep.mubr.msk.f32.mxu1 %vm522_vm0, %v523_v1  ;;  %v438_v4 = vpack.c.bf16 %v42_v3, %v41_v2  ;;  %v126_v6 = vld [vmem:[%s710_s3 + $0x8] sm:$0xff]  ;;  %v128_v9 = vld [vmem:[%s710_s3 + $0x18] sm:$0xff]  ;;  %v40_v10 = vld [vmem:[%s707_s0] sm:$0xff] }
  0x15   :  { %v441_v8 = vpack.c.bf16 %v126_v6, %v125_v5  ;;  %v444_v11 = vpack.c.bf16 %v128_v9, %v127_v7  ;;  %v129_v12 = vld [vmem:[%s710_s3 + $0x20] sm:$0xff]  ;;  %v130_v13 = vld [vmem:[%s710_s3 + $0x28] sm:$0xff]  ;;  %v131_v15 = vld [vmem:[%s710_s3 + $0x30] sm:$0xff] }
  0x16   :  { %439 = vmatpush3.bf16.msra.mxu0 %v438_v4  ;;  %v447_v14 = vpack.c.bf16 %v130_v13, %v129_v12  ;;  %v132_v16 = vld [vmem:[%s710_s3 + $0x38] sm:$0xff]  ;;  %v133_v18 = vld [vmem:[%s710_s3 + $0x40] sm:$0xff]  ;;  %v134_v19 = vld [vmem:[%s710_s3 + $0x48] sm:$0xff] }
  0x17   :  { %442 = vmatpush3.bf16.msra.mxu1 %v441_v8  ;;  %464 = vmatprep.subr.bf16.mxu0 %v521_v0  ;;  %v450_v17 = vpack.c.bf16 %v132_v16, %v131_v15  ;;  %v453_v20 = vpack.c.bf16 %v134_v19, %v133_v18  ;;  %v135_v21 = vld [vmem:[%s710_s3 + $0x50] sm:$0xff]  ;;  %v136_v22 = vld [vmem:[%s710_s3 + $0x58] sm:$0xff]  ;;  %v137_v24 = vld [vmem:[%s710_s3 + $0x60] sm:$0xff] }
  0x18   :  { %443 = vmatprep.subr.bf16.mxu1 %v521_v0  ;;  %v456_v23 = vpack.c.bf16 %v136_v22, %v135_v21  ;;  %v138_v25 = vld [vmem:[%s710_s3 + $0x68] sm:$0xff]  ;;  %v139_v27 = vld [vmem:[%s710_s3 + $0x70] sm:$0xff]  ;;  %v140_v28 = vld [vmem:[%s710_s3 + $0x78] sm:$0xff] }
  0x19   :  { %365 = vmatmul.mubr.msk.f32.vlgmr.msra.gmra.mrb[0].mxu0 %vm50_vm1, %v40_v10  ;;  %v459_v26 = vpack.c.bf16 %v138_v25, %v137_v24  ;;  %v462_v29 = vpack.c.bf16 %v140_v28, %v139_v27  ;;  %v219_v30 = vld [vmem:[%s712_s5] sm:$0xff]  ;;  %v220_v31 = vld [vmem:[%s712_s5 + $0x8] sm:$0xff]  ;;  %v221_v32 = vld [vmem:[%s712_s5 + $0x10] sm:$0xff] }
  0x1a   :  { %434 = vmatprep.mubr.msk.f32.mxu0 %vm522_vm0, %v523_v1  ;;  %v465_v33 = vpack.c.bf16 %v220_v31, %v219_v30  ;;  %v222_v34 = vld [vmem:[%s712_s5 + $0x18] sm:$0xff]  ;;  %v223_v36 = vld [vmem:[%s712_s5 + $0x20] sm:$0xff]  ;;  %v224_v37 = vld [vmem:[%s712_s5 + $0x28] sm:$0xff] }
  0x1b   :  { %445 = vmatpush3.bf16.msra.mxu1 %v444_v11  ;;  %v468_v35 = vpack.c.bf16 %v222_v34, %v221_v32  ;;  %v471_v38 = vpack.c.bf16 %v224_v37, %v223_v36  ;;  %v225_v39 = vld [vmem:[%s712_s5 + $0x30] sm:$0xff]  ;;  %v226_v40 = vld [vmem:[%s712_s5 + $0x38] sm:$0xff]  ;;  %v227_v42 = vld [vmem:[%s712_s5 + $0x40] sm:$0xff] }
  0x1c   :  { %446 = vmatprep.subr.bf16.mxu1 %v521_v0  ;;  %466 = vmatpush3.bf16.msra.mxu0 %v465_v33  ;;  %v474_v41 = vpack.c.bf16 %v226_v40, %v225_v39  ;;  %v228_v43 = vld [vmem:[%s712_s5 + $0x48] sm:$0xff]  ;;  %v229_v45 = vld [vmem:[%s712_s5 + $0x50] sm:$0xff]  ;;  %v230_v46 = vld [vmem:[%s712_s5 + $0x58] sm:$0xff] }
  0x1d   :  { %467 = vmatprep.subr.bf16.mxu0 %v521_v0  ;;  %v477_v44 = vpack.c.bf16 %v228_v43, %v227_v42  ;;  %v480_v47 = vpack.c.bf16 %v230_v46, %v229_v45  ;;  %v231_v48 = vld [vmem:[%s712_s5 + $0x60] sm:$0xff]  ;;  %v232_v49 = vld [vmem:[%s712_s5 + $0x68] sm:$0xff]  ;;  %v233_v56 = vld [vmem:[%s712_s5 + $0x70] sm:$0xff] }
  0x1e   :  { %v483_v50 = vpack.c.bf16 %v232_v49, %v231_v48  ;;  %v319_v51 = vld [vmem:[%s709_s2] ss:$0 sm:$0xff]  ;;  %v234_v57 = vld [vmem:[%s712_s5 + $0x78] sm:$0xff] }
  0x1f   :  { %448 = vmatpush3.bf16.msra.mxu1 %v447_v14  ;;  %v486_v58 = vpack.c.bf16 %v234_v57, %v233_v56  ;;  %v321_v59 = vld [vmem:[%s711_s4] ss:$0 sm:$0xff] }
  0x20   :  { %449 = vmatprep.subr.bf16.mxu1 %v521_v0  ;;  %469 = vmatpush3.bf16.msra.mxu0 %v468_v35 }
  0x21   :  { %470 = vmatprep.subr.bf16.mxu0 %v521_v0 }
  0x23   :  { %451 = vmatpush3.bf16.msra.mxu1 %v450_v17 }
  0x24   :  { %452 = vmatprep.subr.bf16.mxu1 %v521_v0  ;;  %472 = vmatpush3.bf16.msra.mxu0 %v471_v38 }
  0x25   :  { %473 = vmatprep.subr.bf16.mxu0 %v521_v0 }
  0x27   :  { %454 = vmatpush3.bf16.msra.mxu1 %v453_v20 }
  0x28   :  { %455 = vmatprep.subr.bf16.mxu1 %v521_v0  ;;  %475 = vmatpush3.bf16.msra.mxu0 %v474_v41 }
  0x29   :  { %476 = vmatprep.subr.bf16.mxu0 %v521_v0 }
  0x2b   :  { %457 = vmatpush3.bf16.msra.mxu1 %v456_v23 }
  0x2c   :  { %458 = vmatprep.subr.bf16.mxu1 %v521_v0  ;;  %478 = vmatpush3.bf16.msra.mxu0 %v477_v44 }
  0x2d   :  { %479 = vmatprep.subr.bf16.mxu0 %v521_v0 }
  0x2f   :  { %460 = vmatpush3.bf16.msra.mxu1 %v459_v26 }
  0x30   :  { %461 = vmatprep.subr.bf16.mxu1 %v521_v0  ;;  %481 = vmatpush3.bf16.msra.mxu0 %v480_v47 }
  0x31   :  { %482 = vmatprep.subr.bf16.mxu0 %v521_v0 }
  0x33   :  { %463 = vmatpush3.bf16.msra.mxu1 %v462_v29 }
  0x34   :  { %484 = vmatpush3.bf16.msra.mxu0 %v483_v50 }
  0x35   :  { %485 = vmatprep.subr.bf16.mxu0 %v521_v0  ;;  %v322_v0 = vld [vmem:[%s713_s6] ss:$0 sm:$0xff] }
  0x38   :  { %487 = vmatpush3.bf16.msra.mxu0 %v486_v58 }
  0xec   :  { %v120_v52 = vpop.f32.mrb[0].mxu0 }
  0xed   :  { %v121_v53 = vadd.f32 %v319_v51, %v120_v52  ;;  %v366_v54 = vpop.f32.mrb[1].mxu0 }
  0xef   :  { %v124_v55 = vmax.f32 %v121_v53, 0.0 }
  0xf1   :  { %400 = vmatmul.mubr.f32.vlgmr.msra.gmra.mrb[0].mxu1 %v124_v55 }
 0x1c4   :  { %v214_v60 = vpop.f32.mrb[0].mxu1 }
 0x1c5   :  { %v215_v61 = vadd.f32 %v321_v59, %v214_v60  ;;  %v401_v62 = vpop.f32.mrb[1].mxu1 }
 0x1c7   :  { %v218_v63 = vmax.f32 %v215_v61, 0.0 }
 0x1c9   :  { %435 = vmatmul.mubr.f32.vlgmr.msra.gmra.mrb[2].mxu0 %v218_v63 }
 0x29c   :  { %v308_v1 = vpop.f32.mrb[2].mxu0 }
 0x29d   :  { %v309_v2 = vadd.f32 %v322_v0, %v308_v1  ;;  %v436_v3 = vpop.f32.mrb[3].mxu0 }
 0x29f   :  { %313 = vst.msk [vmem:[%s714_s7] sm:$0xff] %vm312_vm2, %v309_v2 }
 0x2a0   :  { %318 = vsyncpa [#allocation3], 1 }

</bundles_post_ra>
